<compile_context>
chip_gen: v7x
topology: tpu7x:2x2x1
jax: 0.10.0
libtpu: 0.0.40
codegen_flags: <defaults>
</compile_context>

<pallas_src>
import math

import jax
import jax.numpy as jnp
from jax.experimental import pallas as pl
from jax.experimental.pallas import tpu as pltpu


def _round_up(v, m):
    return (v + m - 1) // m * m


def fclstm_kernel(x_ref, wih_ref, whh_ref, b_ref, fcw_ref, fcb_ref, out_ref,
                  h_all_ref):
    # Grid: (batch tile i ["parallel", feeds megacore], FC output tile j
    # ["arbitrary"]).
    # NOTE (correctness): the h_all_ref cache relies on j being the innermost,
    # sequentially iterated ("arbitrary") grid axis and on scratch persisting
    # across grid steps on a core: the LSTM runs once at j == 0 and its result
    # is reused by all remaining FC tiles of the same batch tile.  Do not
    # reorder the grid or mark j "parallel".
    j = pl.program_id(1)
    bn, THp = h_all_ref.shape
    Hp = whh_ref.shape[0]
    T = THp // Hp
    mm_dtype = x_ref.dtype        # matmul-operand dtype (fp32, or bf16 if enabled)

    @pl.when(j == 0)
    def _run_lstm():
        # Hoisted input projection: one (T*bn, D) x (D, 4*Hp) matmul, with the
        # folded bias added once (not T times inside the serial chain).
        xW = (jnp.dot(x_ref[...], wih_ref[...],
                      preferred_element_type=jnp.float32)
              + b_ref[...])                                   # (T*bn, 4*Hp) fp32
        whh = whh_ref[...]                                    # (Hp, 4*Hp)
        h = jnp.zeros((bn, Hp), jnp.float32)
        c = jnp.zeros((bn, Hp), jnp.float32)
        # T is static & small (history_length) -> fully unrolled.
        # TODO(synk): hold W_hh in MXU weight registers across the T steps via
        # pltpu.matmul_push_rhs / matmul_acc_lhs / matmul_pop to shave the
        # per-step weight-load latency off the serial chain.
        for t in range(T):
            # Contiguous sublane-aligned time-step slice (bn % 8 == 0) and
            # lane-aligned gate slices (Hp % 128 == 0): full-vreg ops only.
            gates = (xW[t * bn:(t + 1) * bn, :]
                     + jnp.dot(h.astype(mm_dtype), whh,
                               preferred_element_type=jnp.float32))
            i_g = jax.nn.sigmoid(gates[:, 0 * Hp:1 * Hp])
            f_g = jax.nn.sigmoid(gates[:, 1 * Hp:2 * Hp])
            g_g = jnp.tanh(gates[:, 2 * Hp:3 * Hp])
            o_g = jax.nn.sigmoid(gates[:, 3 * Hp:4 * Hp])
            c = f_g * c + i_g * g_g
            h = o_g * jnp.tanh(c)
            h_all_ref[:, t * Hp:(t + 1) * Hp] = h.astype(h_all_ref.dtype)

    # FC output tile: single (bn, T*Hp) x (T*Hp, tn) matmul + bias + ReLU on a
    # lane-dense (tn % 128 == 0) output slab.
    out_ref[...] = jnp.maximum(
        jnp.dot(h_all_ref[...], fcw_ref[...],
                preferred_element_type=jnp.float32) + fcb_ref[...],
        0.0)


def fclstm_forward(x, params, *, hidden_size, prediction_length, reshape=True,
                   use_bf16=False, batch_tile=256,
                   fc_resident_budget=40 << 20):
    wih, whh, b, fcw, fcb = params
    N, T, D = x.shape
    H = hidden_size
    P = prediction_length
    PH = P * H
    Hp = _round_up(H, 128)                  # lane-aligned hidden dim
    f32 = jnp.float32
    mm_dtype = jnp.bfloat16 if use_bf16 else f32
    itemsize = jnp.dtype(mm_dtype).itemsize

    # ---- Batch tile: fill the MXU rows (up to 256) without over-padding tiny
    # batches; keep >= 2 parallel batch tiles when the batch allows so v7x's
    # two TensorCores both get work (v5e/v6e are single-TC, unaffected).
    bn = min(batch_tile, _round_up(max(N, 1), 8))
    if _round_up(N, bn) == bn and bn >= 16:         # would be a single batch tile
        bn = _round_up((bn + 1) // 2, 8)
    Np = _round_up(N, bn)
    n_i = Np // bn

    # ---- FC weight: fully VMEM-resident (fetched once, single-buffered) when
    # it fits a conservative budget that leaves headroom inside v7x's 64 MiB
    # per-TC VMEM; on v5e/v6e (128 MiB) this budget could be raised further.
    # Otherwise stream wide lane-dense tiles (v7x's 3.2 TB/s HBM tolerates it).
    NP0 = _round_up(PH, 128)
    if T * Hp * NP0 * itemsize <= fc_resident_budget:
        tn = NP = NP0
    else:
        tn = min(512, NP0)
        NP = _round_up(PH, tn)
    n_j = NP // tn

    # ---- Wrapper-side re-layout / padding (pure glue, zero kernel cost). ----
    wih = jnp.asarray(wih, f32)
    whh = jnp.asarray(whh, f32)
    b = jnp.asarray(b, f32)
    fcw = jnp.asarray(fcw, f32)
    fcb = jnp.asarray(fcb, f32)

    # W_ih^T with each gate padded to Hp lanes: (D, 4*Hp), gate g -> cols
    # [g*Hp, g*Hp + H).  Padded columns are zero, so padded hidden lanes stay
    # exactly zero through the recurrence (gates=0 -> c=h=0).
    wih_p = (jnp.zeros((D, 4, Hp), f32)
             .at[:, :, :H].set(wih.T.reshape(D, 4, H))
             .reshape(D, 4 * Hp).astype(mm_dtype))
    # W_hh^T with padded hidden rows and per-gate padded columns: (Hp, 4*Hp).
    whh_p = (jnp.zeros((Hp, 4, Hp), f32)
             .at[:H, :, :H].set(whh.T.reshape(H, 4, H))
             .reshape(Hp, 4 * Hp).astype(mm_dtype))
    # Folded bias (b_ih + b_hh), per-gate padded: (1, 4*Hp), kept fp32.
    b_p = (jnp.zeros((4, Hp), f32)
           .at[:, :H].set(b.reshape(4, H))
           .reshape(1, 4 * Hp))
    # FC weight^T with rows permuted to the padded (T, Hp) h_all layout and
    # columns zero-padded to the lane-dense NP: (T*Hp, NP).  Padded rows align
    # with the always-zero padded hidden lanes.
    fcw_p = (jnp.zeros((T, Hp, NP), f32)
             .at[:, :H, :PH].set(fcw.T.reshape(T, H, PH))
             .reshape(T * Hp, NP).astype(mm_dtype))
    fcb_p = jnp.zeros((1, NP), f32).at[:, :PH].set(fcb)

    # x: zero-pad batch to Np and re-layout to per-batch-tile, time-major rows
    #   row  i*(T*bn) + t*bn + r   <->   sample i*bn + r at time t
    # so the kernel needs no reshape and every time step is a contiguous,
    # sublane-aligned (bn, D) slab.
    x_p = jnp.zeros((Np, T, D), f32).at[:N].set(jnp.asarray(x, f32))
    x_tm = (x_p.reshape(n_i, bn, T, D).transpose(0, 2, 1, 3)
            .reshape(n_i * T * bn, D).astype(mm_dtype))

    # ---- Advisory cost estimate (fcw re-read per batch tile when streamed). --
    flops = int(2 * Np * T * D * 4 * Hp            # x @ W_ih^T (hoisted)
                + 2 * Np * T * Hp * 4 * Hp         # h @ W_hh^T (serial)
                + 2 * Np * (T * Hp) * NP)          # fused FC
    fcw_reads = 1 if n_j == 1 else n_i
    bytes_accessed = int(
        itemsize * (x_tm.size + wih_p.size + whh_p.size + fcw_reads * fcw_p.size)
        + 4 * (b_p.size + fcb_p.size + Np * NP))
    cost = pl.CostEstimate(flops=flops,
                           transcendentals=int(5 * Np * T * Hp),
                           bytes_accessed=bytes_accessed)

    # ---- VMEM limit derived from actual usage (never blanket-request 64 MiB,
    # which is the entire physical VMEM of a v7x TensorCore). ----------------
    vmem_est = (2 * T * bn * D * itemsize                        # x tile (dbl-buf)
                + (D + Hp) * 4 * Hp * itemsize                   # W_ih^T + W_hh^T
                + 4 * 4 * Hp                                     # bias
                + (1 if n_j == 1 else 2) * T * Hp * tn * itemsize  # fcw tile(s)
                + (1 if n_j == 1 else 2) * 4 * tn                # fcb tile(s)
                + 2 * bn * tn * 4                                # out tile (dbl-buf)
                + bn * T * Hp * itemsize                         # h_all scratch
                + T * bn * 4 * Hp * 4)                           # xW temp (fp32)
    vmem_limit = int(min(96 << 20, max(32 << 20, int(1.5 * vmem_est))))

    single = pl.Buffered(buffer_count=1)   # grid-invariant inputs: 2nd buffer is waste
    in_specs = [
        pl.BlockSpec((T * bn, D), lambda i, j: (i, 0)),                        # x tile
        pl.BlockSpec((D, 4 * Hp), lambda i, j: (0, 0), pipeline_mode=single),  # W_ih^T
        pl.BlockSpec((Hp, 4 * Hp), lambda i, j: (0, 0), pipeline_mode=single), # W_hh^T
        pl.BlockSpec((1, 4 * Hp), lambda i, j: (0, 0), pipeline_mode=single),  # bias
        (pl.BlockSpec((T * Hp, tn), lambda i, j: (0, j), pipeline_mode=single)
         if n_j == 1 else
         pl.BlockSpec((T * Hp, tn), lambda i, j: (0, j))),                     # fc_W^T
        (pl.BlockSpec((1, tn), lambda i, j: (0, j), pipeline_mode=single)
         if n_j == 1 else
         pl.BlockSpec((1, tn), lambda i, j: (0, j))),                          # fc bias
    ]

    out = pl.pallas_call(
        fclstm_kernel,
        out_shape=jax.ShapeDtypeStruct((Np, NP), jnp.float32),
        grid_spec=pltpu.PrefetchScalarGridSpec(
            num_scalar_prefetch=0,
            grid=(n_i, n_j),
            in_specs=in_specs,
            out_specs=pl.BlockSpec((bn, tn), lambda i, j: (i, j)),
            scratch_shapes=[pltpu.VMEM((bn, T * Hp), mm_dtype)],  # cached h_all
        ),
        compiler_params=pltpu.CompilerParams(
            # j must stay "arbitrary" (see kernel note); i is safely parallel.
            dimension_semantics=("parallel", "arbitrary"),
            vmem_limit_bytes=vmem_limit,
        ),
        cost_estimate=cost,
    )(x_tm, wih_p, whh_p, b_p, fcw_p, fcb_p)

    out = out[:N, :PH]                      # strip batch / lane padding
    if reshape:
        s = int(math.sqrt(H))
        out = out.reshape(N, P, s, s)       # pure glue (wrapper-side)
    return out


def fclstm_reference(x, params, *, hidden_size, prediction_length, reshape=True):
    """Pure-JAX reference mirroring the PyTorch forward (for verification)."""
    wih, whh, b, fcw, fcb = params
    N, T, D = x.shape
    H = hidden_size
    P = prediction_length

    h = jnp.zeros((N, H), jnp.float32)
    c = jnp.zeros((N, H), jnp.float32)
    outs = []
    for t in range(T):
        gates = x[:, t, :] @ wih.T + h @ whh.T + b
        i_g = jax.nn.sigmoid(gates[:, 0 * H:1 * H])
        f_g = jax.nn.sigmoid(gates[:, 1 * H:2 * H])
        g_g = jnp.tanh(gates[:, 2 * H:3 * H])
        o_g = jax.nn.sigmoid(gates[:, 3 * H:4 * H])
        c = f_g * c + i_g * g_g
        h = o_g * jnp.tanh(c)
        outs.append(h)
    flat = jnp.concatenate(outs, axis=1)                 # (N, T*H)
    out = flat @ fcw.T + fcb
    if reshape:
        s = int(math.sqrt(H))
        out = out.reshape(N, P, s, s)
    return jnp.maximum(out, 0.0)


def init_params(key, *, input_size, hidden_size, history_length, prediction_length):
    """Deterministic synthetic params, PyTorch-style uniform(-1/sqrt(H), 1/sqrt(H))."""
    H, D, T, P = hidden_size, input_size, history_length, prediction_length
    k = jax.random.split(key, 6)
    bound = 1.0 / math.sqrt(H)
    wih = jax.random.uniform(k[0], (4 * H, D), jnp.float32, -bound, bound)
    whh = jax.random.uniform(k[1], (4 * H, H), jnp.float32, -bound, bound)
    b_ih = jax.random.uniform(k[2], (4 * H,), jnp.float32, -bound, bound)
    b_hh = jax.random.uniform(k[3], (4 * H,), jnp.float32, -bound, bound)
    b = (b_ih + b_hh).reshape(1, 4 * H)
    fc_bound = 1.0 / math.sqrt(T * H)
    fcw = jax.random.uniform(k[4], (P * H, T * H), jnp.float32, -fc_bound, fc_bound)
    fcb = jax.random.uniform(k[5], (P * H,), jnp.float32, -fc_bound, fc_bound).reshape(1, P * H)
    return wih, whh, b, fcw, fcb


if __name__ == "__main__":
    # Small shapes consistent with the module (hidden_size must be a perfect square).
    input_size = 16
    hidden_size = 16      # sqrt = 4
    history_length = 4
    prediction_length = 1

    key = jax.random.PRNGKey(0)
    kx1, kx2, kp = jax.random.split(key, 3)
    params = init_params(kp,
                         input_size=input_size,
                         hidden_size=hidden_size,
                         history_length=history_length,
                         prediction_length=prediction_length)

    # Case 1: tiny batch (single batch tile).
    x1 = jax.random.normal(kx1, (2, history_length, input_size), jnp.float32)
    out1 = jax.block_until_ready(
        fclstm_forward(x1, params, hidden_size=hidden_size,
                       prediction_length=prediction_length, reshape=True))
    ref1 = fclstm_reference(x1, params, hidden_size=hidden_size,
                            prediction_length=prediction_length, reshape=True)
    assert out1.shape == (2, prediction_length, 4, 4), out1.shape
    assert jnp.allclose(out1, ref1, atol=1e-5, rtol=1e-5), "mismatch vs reference (case 1)"

    # Case 2: non-multiple batch -> exercises multiple batch tiles + batch padding.
    x2 = jax.random.normal(kx2, (20, history_length, input_size), jnp.float32)
    out2 = jax.block_until_ready(
        fclstm_forward(x2, params, hidden_size=hidden_size,
                       prediction_length=prediction_length, reshape=True))
    ref2 = fclstm_reference(x2, params, hidden_size=hidden_size,
                            prediction_length=prediction_length, reshape=True)
    assert out2.shape == (20, prediction_length, 4, 4), out2.shape
    assert jnp.allclose(out2, ref2, atol=1e-5, rtol=1e-5), "mismatch vs reference (case 2)"

    print("KERNEL_OK")
</pallas_src>

<mosaic_0001>
module attributes {stable_mosaic.version = 11 : i64} {
  func.func @fclstm_kernel(%arg0: i32, %arg1: i32, %arg2: memref<32x16xf32, #tpu.memory_space<vmem>>, %arg3: memref<16x512xf32, #tpu.memory_space<vmem>>, %arg4: memref<128x512xf32, #tpu.memory_space<vmem>>, %arg5: memref<1x512xf32, #tpu.memory_space<vmem>>, %arg6: memref<512x128xf32, #tpu.memory_space<vmem>>, %arg7: memref<1x128xf32, #tpu.memory_space<vmem>>, %arg8: memref<8x128xf32, #tpu.memory_space<vmem>>, %arg9: memref<8x512xf32, #tpu.memory_space<vmem>>) attributes {dimension_semantics = [#tpu.dimension_semantics<parallel>, #tpu.dimension_semantics<arbitrary>], iteration_bounds = array<i64: 1, 1>, scalar_prefetch = 0 : i64, scratch_operands = 1 : i64, tpu.core_type = #tpu.core_type<tc>, window_params = [{transform_indices = @transform_0, window_bounds = array<i64: 32, 16>}, {pipeline_mode = #tpu.pipeline_mode<synchronous>, transform_indices = @transform_1, window_bounds = array<i64: 16, 512>}, {pipeline_mode = #tpu.pipeline_mode<synchronous>, transform_indices = @transform_2, window_bounds = array<i64: 128, 512>}, {pipeline_mode = #tpu.pipeline_mode<synchronous>, transform_indices = @transform_3, window_bounds = array<i64: 1, 512>}, {pipeline_mode = #tpu.pipeline_mode<synchronous>, transform_indices = @transform_4, window_bounds = array<i64: 512, 128>}, {pipeline_mode = #tpu.pipeline_mode<synchronous>, transform_indices = @transform_5, window_bounds = array<i64: 1, 128>}, {transform_indices = @transform_6, window_bounds = array<i64: 8, 128>}]} {
    %c0_i32 = arith.constant 0 : i32
    %0 = arith.cmpi eq, %arg1, %c0_i32 : i32
    %1 = arith.extui %0 : i1 to i32
    %c0_i32_0 = arith.constant 0 : i32
    %2 = arith.cmpi ne, %1, %c0_i32_0 : i32
    scf.if %2 {
      %c0_9 = arith.constant 0 : index
      %c0_10 = arith.constant 0 : index
      %12 = vector.load %arg2[%c0_9, %c0_10] : memref<32x16xf32, #tpu.memory_space<vmem>>, vector<32x16xf32>
      %c0_11 = arith.constant 0 : index
      %c0_12 = arith.constant 0 : index
      %13 = vector.load %arg3[%c0_11, %c0_12] : memref<16x512xf32, #tpu.memory_space<vmem>>, vector<16x512xf32>
      %cst_13 = arith.constant dense<0.000000e+00> : vector<32x512xf32>
      %14 = tpu.matmul %12, %13, %cst_13 {dimension_numbers = #tpu.dot_dimension_numbers<[1], [0], [0], [1], [0, 0, 1, 1], [], []>} : vector<32x16xf32>, vector<16x512xf32>, vector<32x512xf32> -> vector<32x512xf32>
      %c0_14 = arith.constant 0 : index
      %c0_15 = arith.constant 0 : index
      %15 = vector.load %arg5[%c0_14, %c0_15] : memref<1x512xf32, #tpu.memory_space<vmem>>, vector<1x512xf32>
      %16 = vector.broadcast %15 : vector<1x512xf32> to vector<32x512xf32>
      %17 = arith.addf %14, %16 : vector<32x512xf32>
      %c0_16 = arith.constant 0 : index
      %c0_17 = arith.constant 0 : index
      %18 = vector.load %arg4[%c0_16, %c0_17] : memref<128x512xf32, #tpu.memory_space<vmem>>, vector<128x512xf32>
      %cst_18 = arith.constant 0.000000e+00 : f32
      %19 = vector.broadcast %cst_18 : f32 to vector<8x128xf32>
      %cst_19 = arith.constant 0.000000e+00 : f32
      %20 = vector.broadcast %cst_19 : f32 to vector<8x128xf32>
      %21 = vector.extract_strided_slice %17 {offsets = [0, 0], sizes = [8, 512], strides = [1, 1]} : vector<32x512xf32> to vector<8x512xf32>
      %cst_20 = arith.constant dense<0.000000e+00> : vector<8x512xf32>
      %22 = tpu.matmul %19, %18, %cst_20 {dimension_numbers = #tpu.dot_dimension_numbers<[1], [0], [0], [1], [0, 0, 1, 1], [], []>} : vector<8x128xf32>, vector<128x512xf32>, vector<8x512xf32> -> vector<8x512xf32>
      %23 = arith.addf %21, %22 : vector<8x512xf32>
      %24 = vector.extract_strided_slice %23 {offsets = [0, 0], sizes = [8, 128], strides = [1, 1]} : vector<8x512xf32> to vector<8x128xf32>
      %25 = arith.negf %24 : vector<8x128xf32>
      %26 = math.exp %25 : vector<8x128xf32>
      %cst_21 = arith.constant 1.000000e+00 : f32
      %27 = vector.broadcast %cst_21 : f32 to vector<8x128xf32>
      %28 = arith.addf %27, %26 : vector<8x128xf32>
      %29 = arith.divf %27, %28 : vector<8x128xf32>
      %30 = vector.extract_strided_slice %23 {offsets = [0, 128], sizes = [8, 128], strides = [1, 1]} : vector<8x512xf32> to vector<8x128xf32>
      %31 = arith.negf %30 : vector<8x128xf32>
      %32 = math.exp %31 : vector<8x128xf32>
      %cst_22 = arith.constant 1.000000e+00 : f32
      %33 = vector.broadcast %cst_22 : f32 to vector<8x128xf32>
      %34 = arith.addf %33, %32 : vector<8x128xf32>
      %35 = arith.divf %33, %34 : vector<8x128xf32>
      %36 = vector.extract_strided_slice %23 {offsets = [0, 256], sizes = [8, 128], strides = [1, 1]} : vector<8x512xf32> to vector<8x128xf32>
      %37 = math.tanh %36 : vector<8x128xf32>
      %38 = vector.extract_strided_slice %23 {offsets = [0, 384], sizes = [8, 128], strides = [1, 1]} : vector<8x512xf32> to vector<8x128xf32>
      %39 = arith.negf %38 : vector<8x128xf32>
      %40 = math.exp %39 : vector<8x128xf32>
      %cst_23 = arith.constant 1.000000e+00 : f32
      %41 = vector.broadcast %cst_23 : f32 to vector<8x128xf32>
      %42 = arith.addf %41, %40 : vector<8x128xf32>
      %43 = arith.divf %41, %42 : vector<8x128xf32>
      %44 = arith.mulf %35, %20 : vector<8x128xf32>
      %45 = arith.mulf %29, %37 : vector<8x128xf32>
      %46 = arith.addf %44, %45 : vector<8x128xf32>
      %47 = math.tanh %46 : vector<8x128xf32>
      %48 = arith.mulf %43, %47 : vector<8x128xf32>
      %c0_24 = arith.constant 0 : index
      %c0_25 = arith.constant 0 : index
      %49 = vector.load %arg9[%c0_24, %c0_25] : memref<8x512xf32, #tpu.memory_space<vmem>>, vector<8x128xf32>
      tpu.vector_store %arg9[%c0_24, %c0_25], %48 {strides = array<i32>} : memref<8x512xf32, #tpu.memory_space<vmem>>, vector<8x128xf32>,
      %50 = vector.extract_strided_slice %17 {offsets = [8, 0], sizes = [8, 512], strides = [1, 1]} : vector<32x512xf32> to vector<8x512xf32>
      %cst_26 = arith.constant dense<0.000000e+00> : vector<8x512xf32>
      %51 = tpu.matmul %48, %18, %cst_26 {dimension_numbers = #tpu.dot_dimension_numbers<[1], [0], [0], [1], [0, 0, 1, 1], [], []>} : vector<8x128xf32>, vector<128x512xf32>, vector<8x512xf32> -> vector<8x512xf32>
      %52 = arith.addf %50, %51 : vector<8x512xf32>
      %53 = vector.extract_strided_slice %52 {offsets = [0, 0], sizes = [8, 128], strides = [1, 1]} : vector<8x512xf32> to vector<8x128xf32>
      %54 = arith.negf %53 : vector<8x128xf32>
      %55 = math.exp %54 : vector<8x128xf32>
      %cst_27 = arith.constant 1.000000e+00 : f32
      %56 = vector.broadcast %cst_27 : f32 to vector<8x128xf32>
      %57 = arith.addf %56, %55 : vector<8x128xf32>
      %58 = arith.divf %56, %57 : vector<8x128xf32>
      %59 = vector.extract_strided_slice %52 {offsets = [0, 128], sizes = [8, 128], strides = [1, 1]} : vector<8x512xf32> to vector<8x128xf32>
      %60 = arith.negf %59 : vector<8x128xf32>
      %61 = math.exp %60 : vector<8x128xf32>
      %cst_28 = arith.constant 1.000000e+00 : f32
      %62 = vector.broadcast %cst_28 : f32 to vector<8x128xf32>
      %63 = arith.addf %62, %61 : vector<8x128xf32>
      %64 = arith.divf %62, %63 : vector<8x128xf32>
      %65 = vector.extract_strided_slice %52 {offsets = [0, 256], sizes = [8, 128], strides = [1, 1]} : vector<8x512xf32> to vector<8x128xf32>
      %66 = math.tanh %65 : vector<8x128xf32>
      %67 = vector.extract_strided_slice %52 {offsets = [0, 384], sizes = [8, 128], strides = [1, 1]} : vector<8x512xf32> to vector<8x128xf32>
      %68 = arith.negf %67 : vector<8x128xf32>
      %69 = math.exp %68 : vector<8x128xf32>
      %cst_29 = arith.constant 1.000000e+00 : f32
      %70 = vector.broadcast %cst_29 : f32 to vector<8x128xf32>
      %71 = arith.addf %70, %69 : vector<8x128xf32>
      %72 = arith.divf %70, %71 : vector<8x128xf32>
      %73 = arith.mulf %64, %46 : vector<8x128xf32>
      %74 = arith.mulf %58, %66 : vector<8x128xf32>
      %75 = arith.addf %73, %74 : vector<8x128xf32>
      %76 = math.tanh %75 : vector<8x128xf32>
      %77 = arith.mulf %72, %76 : vector<8x128xf32>
      %c0_30 = arith.constant 0 : index
      %c128 = arith.constant 128 : index
      %78 = vector.load %arg9[%c0_30, %c128] : memref<8x512xf32, #tpu.memory_space<vmem>>, vector<8x128xf32>
      tpu.vector_store %arg9[%c0_30, %c128], %77 {strides = array<i32>} : memref<8x512xf32, #tpu.memory_space<vmem>>, vector<8x128xf32>,
      %79 = vector.extract_strided_slice %17 {offsets = [16, 0], sizes = [8, 512], strides = [1, 1]} : vector<32x512xf32> to vector<8x512xf32>
      %cst_31 = arith.constant dense<0.000000e+00> : vector<8x512xf32>
      %80 = tpu.matmul %77, %18, %cst_31 {dimension_numbers = #tpu.dot_dimension_numbers<[1], [0], [0], [1], [0, 0, 1, 1], [], []>} : vector<8x128xf32>, vector<128x512xf32>, vector<8x512xf32> -> vector<8x512xf32>
      %81 = arith.addf %79, %80 : vector<8x512xf32>
      %82 = vector.extract_strided_slice %81 {offsets = [0, 0], sizes = [8, 128], strides = [1, 1]} : vector<8x512xf32> to vector<8x128xf32>
      %83 = arith.negf %82 : vector<8x128xf32>
      %84 = math.exp %83 : vector<8x128xf32>
      %cst_32 = arith.constant 1.000000e+00 : f32
      %85 = vector.broadcast %cst_32 : f32 to vector<8x128xf32>
      %86 = arith.addf %85, %84 : vector<8x128xf32>
      %87 = arith.divf %85, %86 : vector<8x128xf32>
      %88 = vector.extract_strided_slice %81 {offsets = [0, 128], sizes = [8, 128], strides = [1, 1]} : vector<8x512xf32> to vector<8x128xf32>
      %89 = arith.negf %88 : vector<8x128xf32>
      %90 = math.exp %89 : vector<8x128xf32>
      %cst_33 = arith.constant 1.000000e+00 : f32
      %91 = vector.broadcast %cst_33 : f32 to vector<8x128xf32>
      %92 = arith.addf %91, %90 : vector<8x128xf32>
      %93 = arith.divf %91, %92 : vector<8x128xf32>
      %94 = vector.extract_strided_slice %81 {offsets = [0, 256], sizes = [8, 128], strides = [1, 1]} : vector<8x512xf32> to vector<8x128xf32>
      %95 = math.tanh %94 : vector<8x128xf32>
      %96 = vector.extract_strided_slice %81 {offsets = [0, 384], sizes = [8, 128], strides = [1, 1]} : vector<8x512xf32> to vector<8x128xf32>
      %97 = arith.negf %96 : vector<8x128xf32>
      %98 = math.exp %97 : vector<8x128xf32>
      %cst_34 = arith.constant 1.000000e+00 : f32
      %99 = vector.broadcast %cst_34 : f32 to vector<8x128xf32>
      %100 = arith.addf %99, %98 : vector<8x128xf32>
      %101 = arith.divf %99, %100 : vector<8x128xf32>
      %102 = arith.mulf %93, %75 : vector<8x128xf32>
      %103 = arith.mulf %87, %95 : vector<8x128xf32>
      %104 = arith.addf %102, %103 : vector<8x128xf32>
      %105 = math.tanh %104 : vector<8x128xf32>
      %106 = arith.mulf %101, %105 : vector<8x128xf32>
      %c0_35 = arith.constant 0 : index
      %c256 = arith.constant 256 : index
      %107 = vector.load %arg9[%c0_35, %c256] : memref<8x512xf32, #tpu.memory_space<vmem>>, vector<8x128xf32>
      tpu.vector_store %arg9[%c0_35, %c256], %106 {strides = array<i32>} : memref<8x512xf32, #tpu.memory_space<vmem>>, vector<8x128xf32>,
      %108 = vector.extract_strided_slice %17 {offsets = [24, 0], sizes = [8, 512], strides = [1, 1]} : vector<32x512xf32> to vector<8x512xf32>
      %cst_36 = arith.constant dense<0.000000e+00> : vector<8x512xf32>
      %109 = tpu.matmul %106, %18, %cst_36 {dimension_numbers = #tpu.dot_dimension_numbers<[1], [0], [0], [1], [0, 0, 1, 1], [], []>} : vector<8x128xf32>, vector<128x512xf32>, vector<8x512xf32> -> vector<8x512xf32>
      %110 = arith.addf %108, %109 : vector<8x512xf32>
      %111 = vector.extract_strided_slice %110 {offsets = [0, 0], sizes = [8, 128], strides = [1, 1]} : vector<8x512xf32> to vector<8x128xf32>
      %112 = arith.negf %111 : vector<8x128xf32>
      %113 = math.exp %112 : vector<8x128xf32>
      %cst_37 = arith.constant 1.000000e+00 : f32
      %114 = vector.broadcast %cst_37 : f32 to vector<8x128xf32>
      %115 = arith.addf %114, %113 : vector<8x128xf32>
      %116 = arith.divf %114, %115 : vector<8x128xf32>
      %117 = vector.extract_strided_slice %110 {offsets = [0, 128], sizes = [8, 128], strides = [1, 1]} : vector<8x512xf32> to vector<8x128xf32>
      %118 = arith.negf %117 : vector<8x128xf32>
      %119 = math.exp %118 : vector<8x128xf32>
      %cst_38 = arith.constant 1.000000e+00 : f32
      %120 = vector.broadcast %cst_38 : f32 to vector<8x128xf32>
      %121 = arith.addf %120, %119 : vector<8x128xf32>
      %122 = arith.divf %120, %121 : vector<8x128xf32>
      %123 = vector.extract_strided_slice %110 {offsets = [0, 256], sizes = [8, 128], strides = [1, 1]} : vector<8x512xf32> to vector<8x128xf32>
      %124 = math.tanh %123 : vector<8x128xf32>
      %125 = vector.extract_strided_slice %110 {offsets = [0, 384], sizes = [8, 128], strides = [1, 1]} : vector<8x512xf32> to vector<8x128xf32>
      %126 = arith.negf %125 : vector<8x128xf32>
      %127 = math.exp %126 : vector<8x128xf32>
      %cst_39 = arith.constant 1.000000e+00 : f32
      %128 = vector.broadcast %cst_39 : f32 to vector<8x128xf32>
      %129 = arith.addf %128, %127 : vector<8x128xf32>
      %130 = arith.divf %128, %129 : vector<8x128xf32>
      %131 = arith.mulf %122, %104 : vector<8x128xf32>
      %132 = arith.mulf %116, %124 : vector<8x128xf32>
      %133 = arith.addf %131, %132 : vector<8x128xf32>
      %134 = math.tanh %133 : vector<8x128xf32>
      %135 = arith.mulf %130, %134 : vector<8x128xf32>
      %c0_40 = arith.constant 0 : index
      %c384 = arith.constant 384 : index
      %136 = vector.load %arg9[%c0_40, %c384] : memref<8x512xf32, #tpu.memory_space<vmem>>, vector<8x128xf32>
      tpu.vector_store %arg9[%c0_40, %c384], %135 {strides = array<i32>} : memref<8x512xf32, #tpu.memory_space<vmem>>, vector<8x128xf32>,
    } else {
    }
    %c0 = arith.constant 0 : index
    %c0_1 = arith.constant 0 : index
    %3 = vector.load %arg9[%c0, %c0_1] : memref<8x512xf32, #tpu.memory_space<vmem>>, vector<8x512xf32>
    %c0_2 = arith.constant 0 : index
    %c0_3 = arith.constant 0 : index
    %4 = vector.load %arg6[%c0_2, %c0_3] : memref<512x128xf32, #tpu.memory_space<vmem>>, vector<512x128xf32>
    %cst = arith.constant dense<0.000000e+00> : vector<8x128xf32>
    %5 = tpu.matmul %3, %4, %cst {dimension_numbers = #tpu.dot_dimension_numbers<[1], [0], [0], [1], [0, 0, 1, 1], [], []>} : vector<8x512xf32>, vector<512x128xf32>, vector<8x128xf32> -> vector<8x128xf32>
    %c0_4 = arith.constant 0 : index
    %c0_5 = arith.constant 0 : index
    %6 = vector.load %arg7[%c0_4, %c0_5] : memref<1x128xf32, #tpu.memory_space<vmem>>, vector<1x128xf32>
    %7 = vector.broadcast %6 : vector<1x128xf32> to vector<8x128xf32>
    %8 = arith.addf %5, %7 : vector<8x128xf32>
    %cst_6 = arith.constant 0.000000e+00 : f32
    %9 = vector.broadcast %cst_6 : f32 to vector<8x128xf32>
    %10 = arith.maximumf %8, %9 : vector<8x128xf32>
    %c0_7 = arith.constant 0 : index
    %c0_8 = arith.constant 0 : index
    %11 = vector.load %arg8[%c0_7, %c0_8] : memref<8x128xf32, #tpu.memory_space<vmem>>, vector<8x128xf32>
    tpu.vector_store %arg8[%c0_7, %c0_8], %10 {strides = array<i32>} : memref<8x128xf32, #tpu.memory_space<vmem>>, vector<8x128xf32>,
    return
  }
  func.func @transform_0(%arg0: i32, %arg1: i32) -> (i32, i32) {
    %c0_i32 = arith.constant 0 : i32
    %c0_i32_0 = arith.constant 0 : i32
    return %arg0, %c0_i32 : i32, i32
  }
  func.func @transform_1(%arg0: i32, %arg1: i32) -> (i32, i32) {
    %c0_i32 = arith.constant 0 : i32
    %c0_i32_0 = arith.constant 0 : i32
    %c0_i32_1 = arith.constant 0 : i32
    return %c0_i32, %c0_i32_0 : i32, i32
  }
  func.func @transform_2(%arg0: i32, %arg1: i32) -> (i32, i32) {
    %c0_i32 = arith.constant 0 : i32
    %c0_i32_0 = arith.constant 0 : i32
    %c0_i32_1 = arith.constant 0 : i32
    return %c0_i32, %c0_i32_0 : i32, i32
  }
  func.func @transform_3(%arg0: i32, %arg1: i32) -> (i32, i32) {
    %c0_i32 = arith.constant 0 : i32
    %c0_i32_0 = arith.constant 0 : i32
    %c0_i32_1 = arith.constant 0 : i32
    return %c0_i32, %c0_i32_0 : i32, i32
  }
  func.func @transform_4(%arg0: i32, %arg1: i32) -> (i32, i32) {
    %c0_i32 = arith.constant 0 : i32
    %c0_i32_0 = arith.constant 0 : i32
    return %c0_i32, %arg1 : i32, i32
  }
  func.func @transform_5(%arg0: i32, %arg1: i32) -> (i32, i32) {
    %c0_i32 = arith.constant 0 : i32
    %c0_i32_0 = arith.constant 0 : i32
    return %c0_i32, %arg1 : i32, i32
  }
  func.func @transform_6(%arg0: i32, %arg1: i32) -> (i32, i32) {
    %c0_i32 = arith.constant 0 : i32
    return %arg0, %arg1 : i32, i32
  }
}

</mosaic_0001>

<bundles_post_ra>
// kernel: tpu_custom_call.1
= control target key start
LH: loop header
LB: loop body
LE: loop exit
PB: predicated region body
PF: predicated region fallthrough
CT: control target
= control target key end

     0   :  { %11 = vsyncpa [#allocation4], 0  ;;  %s2279_s0 = inlined_call_operand.vmem [shape: f32[32,16], index: 0, kind: input, shape index: {}]   ;;  %s2280_s1 = inlined_call_operand.hbm [shape: f32[16,512], index: 1, kind: input, shape index: {}]   ;;  %s2281_s2 = inlined_call_operand.hbm [shape: f32[128,512], index: 2, kind: input, shape index: {}]   ;;  %s2282_s3 = inlined_call_operand.vmem [shape: f32[1,512], index: 3, kind: input, shape index: {}]   ;;  %s2283_s4 = inlined_call_operand.hbm [shape: f32[512,128], index: 4, kind: input, shape index: {}]   ;;  %s2284_s5 = inlined_call_operand.vmem [shape: f32[1,128], index: 5, kind: input, shape index: {}]   ;;  %s2285_s6 = inlined_call_operand.hbm [shape: f32[8,128], index: 6, kind: output, shape index: {}]  }
   0x1   :  { %12 = vsyncpa [#allocation7], 0 }
   0x2   :  { %13 = vsyncpa [#allocation5], 0  ;;  %s1893_s21 = smov [#allocation6]   ;;  %s1894_s23 = smov [#allocation3]  }
   0x3   :  { %s33_s22 = sshll.u32 %s1893_s21, 4  ;;  %s21_s24 = sshll.u32 %s1894_s23, 4  ;;  %s34_s22 = int_to_ptr.vmem [resolvable:$true] %s33_s22  ;;  %s1937_s24 = int_to_ptr.vmem [resolvable:$true] %s21_s24 }
   0x4   :  { %s1799_s27 = scalar_lea.hbm %s2281_s2, 8192 }
   0x5   :  { %p1800_p0 = scmp.ne.s32.totalorder %s2281_s2, %s1799_s27  ;;  %p1803_p1 = scmp.lt.u32.totalorder %s1799_s27, %s2281_s2 }
   0x7   :  { %p1805_p2 = pnand %p1803_p1, %p1800_p0 }
   0x9   :  { %1808 = shalt.err (!%p1805_p2)
}
   0xa   :  { %s1809_s8 = scalar_lea.vmem %s34_s22, 8192  ;;  %p1814_p4 = scmp.lt.s32.totalorder %s34_s22, %s34_s22 }
   0xb   :  { %p1810_p3 = scmp.ne.s32.totalorder %s34_s22, %s1809_s8  ;;  %p1815_p5 = scmp.lt.s32.totalorder %s1809_s8, %s1809_s8 }
   0xd   :  { %p1816_p6 = por %p1815_p5, %p1814_p4 }
   0xf   :  { %p1817_p7 = pnand %p1816_p6, %p1810_p3 }
  0x11   :  { %1820 = shalt.err (!%p1817_p7)
}
  0x12   :  { %s1895_s9 = smov 512   ;;  %s1896_s10 = smov 32  }
  0x13   :  { %39 = dma.hbm_to_vmem [thread:$0]  %s2281_s2, 8192, %s34_s22, [#allocation7], %s1895_s9, %s1895_s9, %s1896_s10  }
  0x14   :  { %s1821_s15 = scalar_lea.hbm %s2280_s1, 1024 }
  0x15   :  { %p1822_p8 = scmp.ne.s32.totalorder %s2280_s1, %s1821_s15  ;;  %p1825_p9 = scmp.lt.u32.totalorder %s1821_s15, %s2280_s1 }
  0x17   :  { %p1827_p10 = pnand %p1825_p9, %p1822_p8 }
  0x19   :  { %1830 = shalt.err (!%p1827_p10)
}
  0x1a   :  { %s1831_s20 = scalar_lea.vmem %s1937_s24, 1024  ;;  %p1836_p12 = scmp.lt.s32.totalorder %s1937_s24, %s1937_s24 }
  0x1b   :  { %p1832_p11 = scmp.ne.s32.totalorder %s1937_s24, %s1831_s20  ;;  %p1837_p13 = scmp.lt.s32.totalorder %s1831_s20, %s1831_s20 }
  0x1d   :  { %p1838_p0 = por %p1837_p13, %p1836_p12 }
  0x1f   :  { %p1839_p1 = pnand %p1838_p0, %p1832_p11 }
  0x21   :  { %1842 = shalt.err (!%p1839_p1)
}
  0x22   :  { %27 = dma.hbm_to_vmem [thread:$0]  %s2280_s1, 1024, %s1937_s24, [#allocation4], %s1895_s9, %s1895_s9, %s1896_s10  }
  0x23   :  { %s1897_s22 = smov [#allocation8]   ;;  %s1843_s27 = scalar_lea.hbm %s2283_s4, 8192 }
  0x24   :  { %s47_s23 = sshll.u32 %s1897_s22, 4  ;;  %p1844_p2 = scmp.ne.s32.totalorder %s2283_s4, %s1843_s27  ;;  %s48_s23 = int_to_ptr.vmem [resolvable:$true] %s47_s23 }
  0x25   :  { %p1847_p3 = scmp.lt.u32.totalorder %s1843_s27, %s2283_s4 }
  0x27   :  { %p1849_p4 = pnand %p1847_p3, %p1844_p2 }
  0x29   :  { %1852 = shalt.err (!%p1849_p4)
}
  0x2a   :  { %s1853_s8 = scalar_lea.vmem %s48_s23, 8192  ;;  %p1858_p6 = scmp.lt.s32.totalorder %s48_s23, %s48_s23 }
  0x2b   :  { %p1854_p5 = scmp.ne.s32.totalorder %s48_s23, %s1853_s8  ;;  %p1859_p7 = scmp.lt.s32.totalorder %s1853_s8, %s1853_s8 }
  0x2d   :  { %p1860_p8 = por %p1859_p7, %p1858_p6 }
  0x2f   :  { %p1861_p9 = pnand %p1860_p8, %p1854_p5 }
  0x31   :  { %1864 = shalt.err (!%p1861_p9)
}
  0x32   :  { %s1898_s1 = smov 128   ;;  %s1899_s24 = smov 8  }
  0x33   :  { %53 = dma.hbm_to_vmem [thread:$0]  %s2283_s4, 8192, %s48_s23, [#allocation7], %s1898_s1, %s1898_s1, %s1899_s24  }
  0x34   :  { %1887 = dma.done.wait [#allocation4], 1024  }
  0x35   :  { %1888 = vsyncadd [#allocation4], 4294966272 }
  0x36   :  { %1889 = dma.done.wait [#allocation7], 16384  }
  0x37   :  { %1890 = vsyncadd [#allocation7], 4294950912  ;;  %v1900_v0 = vmov 0.0   ;;  %v74_v1 = vld [vmem:[#allocation3 + $0x8] sm:$0xff]  ;;  %v76_v3 = vld [vmem:[#allocation3 + $0x18] sm:$0xff]  ;;  %vm103_vm0 = vcmask 130048  }
  0x38   :  { %180 = vmatprep.mubr.f32.mxu0 %v1900_v0  ;;  %269 = vmatprep.mubr.f32.mxu1 %v1900_v0  ;;  %v78_v2 = vld [vmem:[#allocation3 + $0x28] sm:$0xff]  ;;  %v80_v5 = vld [vmem:[#allocation3 + $0x38] sm:$0xff]  ;;  %v73_v6 = vld [vmem:[#allocation3] sm:$0xff]  ;;  %s1901_s20 = smov [#allocation9]  }
  0x39   :  { %v1366_v4 = vpack.c.bf16 %v78_v2, %v74_v1  ;;  %v77_v7 = vld [vmem:[#allocation3 + $0x20] sm:$0xff]  ;;  %v1370_v8 = vpack.c.bf16 %v80_v5, %v76_v3  ;;  %v75_v10 = vld [vmem:[#allocation3 + $0x10] sm:$0xff]  ;;  %v295_v12 = vld [vmem:[#allocation6 + $0x8] sm:$0xff]  ;;  %s1265_s2 = sshll.u32 %s1901_s20, 4  ;;  %s1266_s2 = int_to_ptr.vmem [resolvable:$true] %s1265_s2 }
  0x3a   :  { %v1368_v9 = vpack.c.bf16 %v77_v7, %v73_v6  ;;  %v79_v11 = vld [vmem:[#allocation3 + $0x30] sm:$0xff]  ;;  %v299_v14 = vld [vmem:[#allocation6 + $0x28] sm:$0xff]  ;;  %v297_v15 = vld [vmem:[#allocation6 + $0x18] sm:$0xff]  ;;  %s1865_s21 = scalar_lea.vmem %s1266_s2, 128  ;;  %p1870_p11 = scmp.lt.s32.totalorder %s1266_s2, %s1266_s2 }
  0x3b   :  { %1367 = vmatprep.subr.bf16.mxu0 %v1366_v4  ;;  %v1372_v13 = vpack.c.bf16 %v79_v11, %v75_v10  ;;  %v301_v16 = vld [vmem:[#allocation6 + $0x38] sm:$0xff]  ;;  %1371 = vmatprep.subr.bf16.mxu1 %v1370_v8  ;;  %v1982_v17 = vpack.c.bf16 %v299_v14, %v295_v12  ;;  %v69_v19 = vld [vmem:[%s2279_s0] sm:$0xff]  ;;  %v296_v23 = vld [vmem:[#allocation6 + $0x10] sm:$0xff]  ;;  %p1866_p10 = scmp.ne.s32.totalorder %s1266_s2, %s1865_s21  ;;  %p1871_p12 = scmp.lt.s32.totalorder %s1865_s21, %s1865_s21 }
  0x3c   :  { %1369 = vmatpush1.bf16.msra.mxu0 %v1368_v9  ;;  %v1984_v18 = vpack.c.bf16 %v301_v16, %v297_v15  ;;  %v294_v20 = vld [vmem:[#allocation6] sm:$0xff]  ;;  %v300_v24 = vld [vmem:[#allocation6 + $0x30] sm:$0xff]  ;;  %v303_v25 = vld [vmem:[#allocation6 + $0x48] sm:$0xff] }
  0x3d   :  { %v298_v21 = vld [vmem:[#allocation6 + $0x20] sm:$0xff]  ;;  %1373 = vmatpush1.bf16.msra.mxu1 %v1372_v13  ;;  %1375 = vmatprep.subr.bf16.mxu0 %v1982_v17  ;;  %v1993_v26 = vpack.c.bf16 %v300_v24, %v296_v23  ;;  %v307_v27 = vld [vmem:[#allocation6 + $0x68] sm:$0xff]  ;;  %v305_v28 = vld [vmem:[#allocation6 + $0x58] sm:$0xff]  ;;  %p1872_p13 = por %p1871_p12, %p1870_p11 }
  0x3e   :  { %v1989_v22 = vpack.c.bf16 %v298_v21, %v294_v20  ;;  %1407 = vmatprep.subr.bf16.mxu1 %v1984_v18  ;;  %v309_v29 = vld [vmem:[#allocation6 + $0x78] sm:$0xff]  ;;  %v1996_v30 = vpack.c.bf16 %v307_v27, %v303_v25  ;;  %v302_v32 = vld [vmem:[#allocation6 + $0x40] sm:$0xff]  ;;  %v304_v34 = vld [vmem:[#allocation6 + $0x50] sm:$0xff] }
  0x3f   :  { %1275 = vmatmul.mubr.msk.f32.vlgmr.msra.gmra.mrb[0].mxu0 %vm103_vm0, %v69_v19  ;;  %v1998_v31 = vpack.c.bf16 %v309_v29, %v305_v28  ;;  %v306_v33 = vld [vmem:[#allocation6 + $0x60] sm:$0xff]  ;;  %v308_v36 = vld [vmem:[#allocation6 + $0x70] sm:$0xff]  ;;  %v311_v37 = vld [vmem:[#allocation6 + $0x88] sm:$0xff]  ;;  %p1873_p0 = pnand %p1872_p13, %p1866_p10 }
  0x40   :  { %1279 = vmatmul.mubr.msk.f32.vlgmr.msra.gmra.mrb[0].mxu1 %vm103_vm0, %v69_v19  ;;  %1377 = vmatpush1.bf16.msra.mxu0 %v1989_v22  ;;  %v2002_v35 = vpack.c.bf16 %v306_v33, %v302_v32  ;;  %v315_v38 = vld [vmem:[#allocation6 + $0xa8] sm:$0xff]  ;;  %v2006_v39 = vpack.c.bf16 %v308_v36, %v304_v34  ;;  %v313_v41 = vld [vmem:[#allocation6 + $0x98] sm:$0xff]  ;;  %v310_v43 = vld [vmem:[#allocation6 + $0x80] sm:$0xff] }
  0x41   :  { %1409 = vmatpush1.bf16.msra.mxu1 %v1993_v26  ;;  %1379 = vmatprep.subr.bf16.mxu0 %v1996_v30  ;;  %v2008_v40 = vpack.c.bf16 %v315_v38, %v311_v37  ;;  %v317_v42 = vld [vmem:[#allocation6 + $0xb8] sm:$0xff]  ;;  %v314_v45 = vld [vmem:[#allocation6 + $0xa0] sm:$0xff]  ;;  %v312_v46 = vld [vmem:[#allocation6 + $0x90] sm:$0xff] }
  0x42   :  { %1411 = vmatprep.subr.bf16.mxu1 %v1998_v31  ;;  %v2011_v44 = vpack.c.bf16 %v317_v42, %v313_v41  ;;  %v316_v47 = vld [vmem:[#allocation6 + $0xb0] sm:$0xff]  ;;  %186 = vmatprep.mubr.f32.mxu0 %v1900_v0  ;;  %v319_v48 = vld [vmem:[#allocation6 + $0xc8] sm:$0xff]  ;;  %v321_v50 = vld [vmem:[#allocation6 + $0xd8] sm:$0xff]  ;;  %v2016_v51 = vpack.c.bf16 %v314_v45, %v310_v43 }
  0x43   :  { %v323_v49 = vld [vmem:[#allocation6 + $0xe8] sm:$0xff]  ;;  %275 = vmatprep.mubr.f32.mxu1 %v1900_v0  ;;  %v325_v52 = vld [vmem:[#allocation6 + $0xf8] sm:$0xff]  ;;  %v2020_v53 = vpack.c.bf16 %v316_v47, %v312_v46  ;;  %v318_v55 = vld [vmem:[#allocation6 + $0xc0] sm:$0xff] }
  0x44   :  { %1381 = vmatpush1.bf16.msra.mxu0 %v2002_v35  ;;  %v2022_v54 = vpack.c.bf16 %v323_v49, %v319_v48  ;;  %v322_v56 = vld [vmem:[#allocation6 + $0xe0] sm:$0xff]  ;;  %v320_v57 = vld [vmem:[#allocation6 + $0xd0] sm:$0xff]  ;;  %v2025_v58 = vpack.c.bf16 %v325_v52, %v321_v50  ;;  %v327_v60 = vld [vmem:[#allocation6 + $0x108] sm:$0xff] }
  0x45   :  { %1413 = vmatpush1.bf16.msra.mxu1 %v2006_v39  ;;  %1383 = vmatprep.subr.bf16.mxu0 %v2008_v40  ;;  %v324_v59 = vld [vmem:[#allocation6 + $0xf0] sm:$0xff]  ;;  %v331_v61 = vld [vmem:[#allocation6 + $0x128] sm:$0xff]  ;;  %v329_v62 = vld [vmem:[#allocation6 + $0x118] sm:$0xff]  ;;  %v2028_v1 = vpack.c.bf16 %v322_v56, %v318_v55 }
  0x46   :  { %1415 = vmatprep.subr.bf16.mxu1 %v2011_v44  ;;  %v333_v63 = vld [vmem:[#allocation6 + $0x138] sm:$0xff]  ;;  %v70_v2 = vld [vmem:[%s2279_s0 + $0x8] sm:$0xff]  ;;  %v2035_v3 = vpack.c.bf16 %v324_v59, %v320_v57  ;;  %v2037_v4 = vpack.c.bf16 %v331_v61, %v327_v60  ;;  %v326_v5 = vld [vmem:[#allocation6 + $0x100] sm:$0xff] }
  0x47   :  { %v330_v6 = vld [vmem:[#allocation6 + $0x120] sm:$0xff]  ;;  %v328_v7 = vld [vmem:[#allocation6 + $0x110] sm:$0xff]  ;;  %v2040_v8 = vpack.c.bf16 %v333_v63, %v329_v62  ;;  %1276 = vmatmul.mubr.msk.f32.gmra.mrb[2].mxu0 %vm103_vm0, %v70_v2  ;;  %v335_v10 = vld [vmem:[#allocation6 + $0x148] sm:$0xff]  ;;  %1280 = vmatmul.mubr.msk.f32.gmra.mrb[2].mxu1 %vm103_vm0, %v70_v2  ;;  %v83_v2 = vlaneseq }
  0x48   :  { %1385 = vmatpush1.bf16.msra.mxu0 %v2016_v51  ;;  %v332_v9 = vld [vmem:[#allocation6 + $0x130] sm:$0xff]  ;;  %v339_v11 = vld [vmem:[#allocation6 + $0x168] sm:$0xff]  ;;  %v337_v12 = vld [vmem:[#allocation6 + $0x158] sm:$0xff]  ;;  %192 = vmatprep.mubr.f32.mxu0 %v1900_v0  ;;  %v2049_v15 = vpack.c.bf16 %v330_v6, %v326_v5 }
  0x49   :  { %1417 = vmatpush1.bf16.msra.mxu1 %v2020_v53  ;;  %1387 = vmatprep.subr.bf16.mxu0 %v2022_v54  ;;  %v341_v13 = vld [vmem:[#allocation6 + $0x178] sm:$0xff]  ;;  %v71_v14 = vld [vmem:[%s2279_s0 + $0x10] sm:$0xff]  ;;  %v2054_v16 = vpack.c.bf16 %v332_v9, %v328_v7  ;;  %v2056_v19 = vpack.c.bf16 %v339_v11, %v335_v10  ;;  %v334_v20 = vld [vmem:[#allocation6 + $0x140] sm:$0xff]  ;;  %v84_v5 = vshrl.u32 %v83_v2, 7 }
  0x4a   :  { %1419 = vmatprep.subr.bf16.mxu1 %v2025_v58  ;;  %281 = vmatprep.mubr.f32.mxu1 %v1900_v0  ;;  %v338_v21 = vld [vmem:[#allocation6 + $0x160] sm:$0xff]  ;;  %v336_v23 = vld [vmem:[#allocation6 + $0x150] sm:$0xff]  ;;  %v2059_v24 = vpack.c.bf16 %v341_v13, %v337_v12  ;;  %v343_v27 = vld [vmem:[#allocation6 + $0x188] sm:$0xff] }
  0x4b   :  { %v340_v25 = vld [vmem:[#allocation6 + $0x170] sm:$0xff]  ;;  %1277 = vmatmul.mubr.msk.f32.gmra.mrb[4].mxu0 %vm103_vm0, %v71_v14  ;;  %v347_v28 = vld [vmem:[#allocation6 + $0x1a8] sm:$0xff]  ;;  %1281 = vmatmul.mubr.msk.f32.gmra.mrb[4].mxu1 %vm103_vm0, %v71_v14  ;;  %v345_v29 = vld [vmem:[#allocation6 + $0x198] sm:$0xff]  ;;  %v2068_v34 = vpack.c.bf16 %v338_v21, %v334_v20  ;;  %v85_v6 = vsub.s32 0, %v84_v5  ;;  %v89_v9 = vsub.s32 1, %v84_v5  ;;  %v97_v13 = vsub.s32 3, %v84_v5 }
  0x4c   :  { %1389 = vmatpush1.bf16.msra.mxu0 %v2028_v1  ;;  %v349_v32 = vld [vmem:[#allocation6 + $0x1b8] sm:$0xff]  ;;  %198 = vmatprep.mubr.f32.mxu0 %v1900_v0  ;;  %v2073_v36 = vpack.c.bf16 %v340_v25, %v336_v23  ;;  %v2075_v37 = vpack.c.bf16 %v347_v28, %v343_v27  ;;  %v342_v38 = vld [vmem:[#allocation6 + $0x180] sm:$0xff]  ;;  %v344_v42 = vld [vmem:[#allocation6 + $0x190] sm:$0xff] }
  0x4d   :  { %1421 = vmatpush1.bf16.msra.mxu1 %v2035_v3  ;;  %1391 = vmatprep.subr.bf16.mxu0 %v2037_v4  ;;  %v72_v33 = vld [vmem:[%s2279_s0 + $0x18] sm:$0xff]  ;;  %v346_v41 = vld [vmem:[#allocation6 + $0x1a0] sm:$0xff]  ;;  %v2078_v43 = vpack.c.bf16 %v349_v32, %v345_v29  ;;  %v348_v45 = vld [vmem:[#allocation6 + $0x1b0] sm:$0xff]  ;;  %v93_v32 = vsub.s32 2, %v84_v5 }
  0x4e   :  { %1423 = vmatprep.subr.bf16.mxu1 %v2040_v8  ;;  %287 = vmatprep.mubr.f32.mxu1 %v1900_v0  ;;  %v351_v46 = vld [vmem:[#allocation6 + $0x1c8] sm:$0xff]  ;;  %v353_v48 = vld [vmem:[#allocation6 + $0x1d8] sm:$0xff]  ;;  %v2084_v50 = vpack.c.bf16 %v346_v41, %v342_v38  ;;  %v2089_v52 = vpack.c.bf16 %v348_v45, %v344_v42  ;;  %v350_v56 = vld [vmem:[#allocation6 + $0x1c0] sm:$0xff] }
  0x4f   :  { %1278 = vmatmul.mubr.msk.f32.gmra.mrb[6].mxu0 %vm103_vm0, %v72_v33  ;;  %v355_v47 = vld [vmem:[#allocation6 + $0x1e8] sm:$0xff]  ;;  %1282 = vmatmul.mubr.msk.f32.gmra.mrb[6].mxu1 %vm103_vm0, %v72_v33  ;;  %v357_v49 = vld [vmem:[#allocation6 + $0x1f8] sm:$0xff]  ;;  %v354_v57 = vld [vmem:[#allocation6 + $0x1e0] sm:$0xff] }
  0x50   :  { %1393 = vmatpush1.bf16.msra.mxu0 %v2049_v15  ;;  %422 = vmatprep.mubr.f32.mxu0 %v1900_v0  ;;  %v2091_v55 = vpack.c.bf16 %v355_v47, %v351_v46  ;;  %v2094_v59 = vpack.c.bf16 %v357_v49, %v353_v48  ;;  %v352_v60 = vld [vmem:[#allocation6 + $0x1d0] sm:$0xff]  ;;  %v2097_v62 = vpack.c.bf16 %v354_v57, %v350_v56  ;;  %v81_v7 = vld [vmem:[%s2282_s3] sm:$0xf] }
  0x51   :  { %1425 = vmatpush1.bf16.msra.mxu1 %v2054_v16  ;;  %1395 = vmatprep.subr.bf16.mxu0 %v2056_v19  ;;  %v356_v61 = vld [vmem:[#allocation6 + $0x1f0] sm:$0xff]  ;;  %v2147_v10 = vrot.slane %v81_v7, %v85_v6  ;;  %v2149_v11 = vrot.slane %v81_v7, %v89_v9  ;;  %v2153_v29 = vrot.slane %v81_v7, %v97_v13 }
  0x52   :  { %1427 = vmatprep.subr.bf16.mxu1 %v2059_v24  ;;  %493 = vmatprep.mubr.f32.mxu1 %v1900_v0  ;;  %v2101_v63 = vpack.c.bf16 %v356_v61, %v352_v60  ;;  %v2156_v38 = vrot.slane %v81_v7, %v93_v32 }
  0x54   :  { %1397 = vmatpush1.bf16.msra.mxu0 %v2068_v34 }
  0x55   :  { %1429 = vmatpush1.bf16.msra.mxu1 %v2073_v36  ;;  %1399 = vmatprep.subr.bf16.mxu0 %v2075_v37 }
  0x56   :  { %1431 = vmatprep.subr.bf16.mxu1 %v2078_v43 }
  0x58   :  { %1401 = vmatpush1.bf16.msra.mxu0 %v2084_v50 }
  0x59   :  { %1433 = vmatpush1.bf16.msra.mxu1 %v2089_v52  ;;  %1403 = vmatprep.subr.bf16.mxu0 %v2091_v55 }
  0x5a   :  { %1435 = vmatprep.subr.bf16.mxu1 %v2094_v59 }
  0x5c   :  { %1405 = vmatpush1.bf16.msra.mxu0 %v2097_v62 }
  0x5d   :  { %1437 = vmatpush1.bf16.msra.mxu1 %v2101_v63  ;;  %1439 = vmatprep.subr.bf16.mxu0 %v1982_v17 }
  0x5e   :  { %1471 = vmatprep.subr.bf16.mxu1 %v1984_v18 }
  0x5f   :  { %423 = vmatmul.mubr.f32.vlgmr.msra.gmra.mrb[0].mxu0 %v1900_v0 }
  0x60   :  { %494 = vmatmul.mubr.f32.vlgmr.msra.gmra.mrb[0].mxu1 %v1900_v0  ;;  %1441 = vmatpush1.bf16.msra.mxu0 %v1989_v22 }
  0x61   :  { %1473 = vmatpush1.bf16.msra.mxu1 %v1993_v26  ;;  %1443 = vmatprep.subr.bf16.mxu0 %v1996_v30 }
  0x62   :  { %1475 = vmatprep.subr.bf16.mxu1 %v1998_v31  ;;  %593 = vmatprep.mubr.f32.mxu0 %v1900_v0 }
  0x63   :  { %664 = vmatprep.mubr.f32.mxu1 %v1900_v0 }
  0x64   :  { %1445 = vmatpush1.bf16.msra.mxu0 %v2002_v35 }
  0x65   :  { %1477 = vmatpush1.bf16.msra.mxu1 %v2006_v39  ;;  %1447 = vmatprep.subr.bf16.mxu0 %v2008_v40 }
  0x66   :  { %1479 = vmatprep.subr.bf16.mxu1 %v2011_v44 }
  0x68   :  { %1449 = vmatpush1.bf16.msra.mxu0 %v2016_v51 }
  0x69   :  { %1481 = vmatpush1.bf16.msra.mxu1 %v2020_v53  ;;  %1451 = vmatprep.subr.bf16.mxu0 %v2022_v54 }
  0x6a   :  { %1483 = vmatprep.subr.bf16.mxu1 %v2025_v58 }
  0x6c   :  { %1453 = vmatpush1.bf16.msra.mxu0 %v2028_v1 }
  0x6d   :  { %1485 = vmatpush1.bf16.msra.mxu1 %v2035_v3  ;;  %1455 = vmatprep.subr.bf16.mxu0 %v2037_v4 }
  0x6e   :  { %1487 = vmatprep.subr.bf16.mxu1 %v2040_v8 }
  0x70   :  { %1457 = vmatpush1.bf16.msra.mxu0 %v2049_v15 }
  0x71   :  { %1489 = vmatpush1.bf16.msra.mxu1 %v2054_v16  ;;  %1459 = vmatprep.subr.bf16.mxu0 %v2056_v19 }
  0x72   :  { %1491 = vmatprep.subr.bf16.mxu1 %v2059_v24 }
  0x74   :  { %1461 = vmatpush1.bf16.msra.mxu0 %v2068_v34 }
  0x75   :  { %1493 = vmatpush1.bf16.msra.mxu1 %v2073_v36  ;;  %1463 = vmatprep.subr.bf16.mxu0 %v2075_v37 }
  0x76   :  { %1495 = vmatprep.subr.bf16.mxu1 %v2078_v43 }
  0x78   :  { %1465 = vmatpush1.bf16.msra.mxu0 %v2084_v50 }
  0x79   :  { %1497 = vmatpush1.bf16.msra.mxu1 %v2089_v52  ;;  %1467 = vmatprep.subr.bf16.mxu0 %v2091_v55 }
  0x7a   :  { %1499 = vmatprep.subr.bf16.mxu1 %v2094_v59 }
  0x7c   :  { %1469 = vmatpush1.bf16.msra.mxu0 %v2097_v62 }
  0x7d   :  { %1501 = vmatpush1.bf16.msra.mxu1 %v2101_v63  ;;  %1503 = vmatprep.subr.bf16.mxu0 %v1982_v17 }
  0x7e   :  { %1535 = vmatprep.subr.bf16.mxu1 %v1984_v18 }
 0x132   :  { %v424_v12 = vpop.f32.mrb[0].mxu0 }
 0x133   :  { %v1694_v14 = vadd.f32 %v424_v12, %v2147_v10  ;;  %v495_v20 = vpop.f32.mrb[0].mxu1  ;;  %v426_v21 = vpop.f32.mrb[1].mxu0 }
 0x134   :  { %v1695_v23 = vadd.f32 %v426_v21, %v2149_v11  ;;  %v497_v25 = vpop.f32.mrb[1].mxu1  ;;  %v1702_v42 = vadd.f32 %v495_v20, %v2156_v38 }
 0x135   :  { %v1283_v27 = vmul.f32 -1.442695, %v1694_v14  ;;  %v1703_v33 = vadd.f32 %v497_v25, %v2153_v29 }
 0x136   :  { %v1284_v28 = vmul.f32 -1.442695, %v1695_v23 }
 0x137   :  { %1735 = vpow2.f32 %v1283_v27  ;;  %v1285_v41 = vmul.f32 -1.442695, %v1703_v33 }
 0x138   :  { %1737 = vpow2.f32 %v1284_v28 }
 0x139   :  { %1739 = vpow2.f32 %v1285_v41 }
 0x13a   :  { %1741 = vtanh.f32 %v1702_v42 }
 0x141   :  { %v1736_v45 = vpop.eup %1735 }
 0x142   :  { %v1738_v46 = vpop.eup %1737  ;;  %v507_v47 = vadd.f32 1.0, %v1736_v45 }
 0x143   :  { %v513_v48 = vadd.f32 1.0, %v1738_v46  ;;  %v1740_v49 = vpop.eup %1739 }
 0x144   :  { %1743 = vrcp.f32 %v507_v47  ;;  %v1742_v56 = vpop.eup %1741  ;;  %v520_v2 = vadd.f32 1.0, %v1740_v49 }
 0x145   :  { %1745 = vrcp.f32 %v513_v48 }
 0x146   :  { %1747 = vrcp.f32 %v520_v2 }
 0x14e   :  { %v1744_v57 = vpop.eup %1743 }
 0x14f   :  { %v1746_v60 = vpop.eup %1745  ;;  %v524_v61 = vmul.f32 %v1744_v57, %v1742_v56 }
 0x150   :  { %v523_v5 = vmul.f32 0.0, %v1746_v60  ;;  %v1748_v7 = vpop.eup %1747 }
 0x152   :  { %v2159_v6 = vadd.f32 %v524_v61, %v523_v5 }
 0x154   :  { %1749 = vtanh.f32 %v2159_v6 }
 0x15e   :  { %v1750_v9 = vpop.eup %1749 }
 0x15f   :  { %v2162_v12 = vmul.f32 %v1750_v9, %v1748_v7 }
 0x161   :  { %594 = vmatmul.mubr.f32.vlgmr.msra.gmra.mrb[2].mxu0 %v2162_v12  ;;  %665 = vmatmul.mubr.f32.vlgmr.msra.gmra.mrb[2].mxu1 %v2162_v12 }
 0x162   :  { %1505 = vmatpush1.bf16.msra.mxu0 %v1989_v22  ;;  %1537 = vmatpush1.bf16.msra.mxu1 %v1993_v26 }
 0x163   :  { %1507 = vmatprep.subr.bf16.mxu0 %v1996_v30  ;;  %1539 = vmatprep.subr.bf16.mxu1 %v1998_v31 }
 0x164   :  { %764 = vmatprep.mubr.f32.mxu0 %v1900_v0  ;;  %835 = vmatprep.mubr.f32.mxu1 %v1900_v0 }
 0x166   :  { %1509 = vmatpush1.bf16.msra.mxu0 %v2002_v35  ;;  %1541 = vmatpush1.bf16.msra.mxu1 %v2006_v39 }
 0x167   :  { %1511 = vmatprep.subr.bf16.mxu0 %v2008_v40  ;;  %1543 = vmatprep.subr.bf16.mxu1 %v2011_v44 }
 0x16a   :  { %1513 = vmatpush1.bf16.msra.mxu0 %v2016_v51  ;;  %1545 = vmatpush1.bf16.msra.mxu1 %v2020_v53 }
 0x16b   :  { %1515 = vmatprep.subr.bf16.mxu0 %v2022_v54  ;;  %1547 = vmatprep.subr.bf16.mxu1 %v2025_v58 }
 0x16e   :  { %1517 = vmatpush1.bf16.msra.mxu0 %v2028_v1  ;;  %1549 = vmatpush1.bf16.msra.mxu1 %v2035_v3 }
 0x16f   :  { %1519 = vmatprep.subr.bf16.mxu0 %v2037_v4  ;;  %1551 = vmatprep.subr.bf16.mxu1 %v2040_v8 }
 0x172   :  { %1521 = vmatpush1.bf16.msra.mxu0 %v2049_v15  ;;  %1553 = vmatpush1.bf16.msra.mxu1 %v2054_v16 }
 0x173   :  { %1523 = vmatprep.subr.bf16.mxu0 %v2056_v19  ;;  %1555 = vmatprep.subr.bf16.mxu1 %v2059_v24 }
 0x176   :  { %1525 = vmatpush1.bf16.msra.mxu0 %v2068_v34  ;;  %1557 = vmatpush1.bf16.msra.mxu1 %v2073_v36 }
 0x177   :  { %1527 = vmatprep.subr.bf16.mxu0 %v2075_v37  ;;  %1559 = vmatprep.subr.bf16.mxu1 %v2078_v43 }
 0x17a   :  { %1529 = vmatpush1.bf16.msra.mxu0 %v2084_v50  ;;  %1561 = vmatpush1.bf16.msra.mxu1 %v2089_v52 }
 0x17b   :  { %1531 = vmatprep.subr.bf16.mxu0 %v2091_v55  ;;  %1563 = vmatprep.subr.bf16.mxu1 %v2094_v59 }
 0x17e   :  { %1533 = vmatpush1.bf16.msra.mxu0 %v2097_v62  ;;  %1565 = vmatpush1.bf16.msra.mxu1 %v2101_v63 }
 0x17f   :  { %1567 = vmatprep.subr.bf16.mxu0 %v1982_v17  ;;  %1599 = vmatprep.subr.bf16.mxu1 %v1984_v18 }
 0x234   :  { %v595_v13 = vpop.f32.mrb[2].mxu0  ;;  %v666_v14 = vpop.f32.mrb[2].mxu1 }
 0x235   :  { %v1696_v20 = vadd.f32 %v595_v13, %v2147_v10  ;;  %v597_v21 = vpop.f32.mrb[3].mxu0  ;;  %v668_v23 = vpop.f32.mrb[3].mxu1  ;;  %v1704_v41 = vadd.f32 %v666_v14, %v2156_v38 }
 0x236   :  { %v1697_v25 = vadd.f32 %v597_v21, %v2149_v11  ;;  %v1705_v32 = vadd.f32 %v668_v23, %v2153_v29  ;;  %v1049_v21 = vld [vmem:[#allocation8 + $0x18] sm:$0xff]  ;;  %v1066_v23 = vld [vmem:[#allocation8 + $0xa0] sm:$0xff] }
 0x237   :  { %v1286_v27 = vmul.f32 -1.442695, %v1696_v20  ;;  %v1048_v20 = vld [vmem:[#allocation8 + $0x10] sm:$0xff] }
 0x238   :  { %v1287_v28 = vmul.f32 -1.442695, %v1697_v25  ;;  %v1288_v33 = vmul.f32 -1.442695, %v1705_v32  ;;  %v1067_v25 = vld [vmem:[#allocation8 + $0xa8] sm:$0xff]  ;;  %v1050_v32 = vld [vmem:[#allocation8 + $0x20] sm:$0xff] }
 0x239   :  { %1751 = vpow2.f32 %v1286_v27  ;;  %v1636_v27 = vpack.c.bf16 %v1049_v21, %v1048_v20  ;;  %v1101_v20 = vld [vmem:[#allocation8 + $0x1b8] sm:$0xff] }
 0x23a   :  { %1753 = vpow2.f32 %v1287_v28  ;;  %v1638_v28 = vpack.c.bf16 %v1067_v25, %v1066_v23  ;;  %v1084_v23 = vld [vmem:[#allocation8 + $0x130] sm:$0xff]  ;;  %v1085_v25 = vld [vmem:[#allocation8 + $0x138] sm:$0xff] }
 0x23b   :  { %1755 = vpow2.f32 %v1288_v33  ;;  %v1051_v33 = vld [vmem:[#allocation8 + $0x28] sm:$0xff] }
 0x23c   :  { %1757 = vtanh.f32 %v1704_v41  ;;  %v1068_v41 = vld [vmem:[#allocation8 + $0xb0] sm:$0xff] }
 0x243   :  { %v1752_v17 = vpop.eup %1751 }
 0x244   :  { %v1754_v42 = vpop.eup %1753  ;;  %v678_v18 = vadd.f32 1.0, %v1752_v17  ;;  %v1069_v17 = vld [vmem:[#allocation8 + $0xb8] sm:$0xff] }
 0x245   :  { %v684_v45 = vadd.f32 1.0, %v1754_v42  ;;  %v1756_v46 = vpop.eup %1755  ;;  %v1640_v42 = vpack.c.bf16 %v1051_v33, %v1050_v32  ;;  %v1103_v32 = vld [vmem:[#allocation8 + $0x1c8] sm:$0xff] }
 0x246   :  { %1759 = vrcp.f32 %v678_v18  ;;  %v1758_v47 = vpop.eup %1757  ;;  %v691_v57 = vadd.f32 1.0, %v1756_v46  ;;  %v1642_v18 = vpack.c.bf16 %v1069_v17, %v1068_v41  ;;  %v1053_v46 = vld [vmem:[#allocation8 + $0x38] sm:$0xff]  ;;  %v1086_v41 = vld [vmem:[#allocation8 + $0x140] sm:$0xff]  ;;  %v1087_v17 = vld [vmem:[#allocation8 + $0x148] sm:$0xff] }
 0x247   :  { %1761 = vrcp.f32 %v684_v45  ;;  %v1052_v45 = vld [vmem:[#allocation8 + $0x30] sm:$0xff] }
 0x248   :  { %1763 = vrcp.f32 %v691_v57  ;;  %v1054_v57 = vld [vmem:[#allocation8 + $0x40] sm:$0xff] }
 0x250   :  { %v1760_v48 = vpop.eup %1759 }
 0x251   :  { %v1762_v49 = vpop.eup %1761  ;;  %v695_v56 = vmul.f32 %v1760_v48, %v1758_v47  ;;  %v1070_v47 = vld [vmem:[#allocation8 + $0xc0] sm:$0xff]  ;;  %v1071_v48 = vld [vmem:[#allocation8 + $0xc8] sm:$0xff] }
 0x252   :  { %v694_v60 = vmul.f32 %v1762_v49, %v2159_v6  ;;  %v1764_v2 = vpop.eup %1763  ;;  %v1644_v49 = vpack.c.bf16 %v1053_v46, %v1052_v45  ;;  %v1105_v45 = vld [vmem:[#allocation8 + $0x1d8] sm:$0xff] }
 0x254   :  { %v2205_v61 = vadd.f32 %v695_v56, %v694_v60  ;;  %v1646_v56 = vpack.c.bf16 %v1071_v48, %v1070_v47  ;;  %v1055_v60 = vld [vmem:[#allocation8 + $0x48] sm:$0xff]  ;;  %v1088_v47 = vld [vmem:[#allocation8 + $0x150] sm:$0xff]  ;;  %v1089_v48 = vld [vmem:[#allocation8 + $0x158] sm:$0xff] }
 0x256   :  { %1765 = vtanh.f32 %v2205_v61 }
 0x260   :  { %v1766_v5 = vpop.eup %1765 }
 0x261   :  { %v2208_v7 = vmul.f32 %v1766_v5, %v1764_v2  ;;  %v1073_v2 = vld [vmem:[#allocation8 + $0xd8] sm:$0xff]  ;;  %v1648_v5 = vpack.c.bf16 %v1055_v60, %v1054_v57  ;;  %v1107_v57 = vld [vmem:[#allocation8 + $0x1e8] sm:$0xff]  ;;  %v1090_v60 = vld [vmem:[#allocation8 + $0x160] sm:$0xff] }
 0x263   :  { %765 = vmatmul.mubr.f32.vlgmr.msra.gmra.mrb[4].mxu0 %v2208_v7  ;;  %836 = vmatmul.mubr.f32.vlgmr.msra.gmra.mrb[4].mxu1 %v2208_v7 }
 0x264   :  { %1569 = vmatpush1.bf16.msra.mxu0 %v1989_v22  ;;  %1601 = vmatpush1.bf16.msra.mxu1 %v1993_v26  ;;  %v1063_v22 = vld [vmem:[#allocation8 + $0x88] sm:$0xff] }
 0x265   :  { %1571 = vmatprep.subr.bf16.mxu0 %v1996_v30  ;;  %1603 = vmatprep.subr.bf16.mxu1 %v1998_v31 }
 0x266   :  { %935 = vmatprep.mubr.f32.mxu0 %v1900_v0  ;;  %1006 = vmatprep.mubr.f32.mxu1 %v1900_v0  ;;  %v1062_v0 = vld [vmem:[#allocation8 + $0x80] sm:$0xff] }
 0x267   :  { %v1630_v26 = vpack.c.bf16 %v1063_v22, %v1062_v0  ;;  %v1056_v0 = vld [vmem:[#allocation8 + $0x50] sm:$0xff]  ;;  %v1057_v22 = vld [vmem:[#allocation8 + $0x58] sm:$0xff] }
 0x268   :  { %1573 = vmatpush1.bf16.msra.mxu0 %v2002_v35  ;;  %1605 = vmatpush1.bf16.msra.mxu1 %v2006_v39 }
 0x269   :  { %1575 = vmatprep.subr.bf16.mxu0 %v2008_v40  ;;  %1607 = vmatprep.subr.bf16.mxu1 %v2011_v44 }
 0x26c   :  { %1577 = vmatpush1.bf16.msra.mxu0 %v2016_v51  ;;  %1609 = vmatpush1.bf16.msra.mxu1 %v2020_v53 }
 0x26d   :  { %1579 = vmatprep.subr.bf16.mxu0 %v2022_v54  ;;  %1611 = vmatprep.subr.bf16.mxu1 %v2025_v58 }
 0x270   :  { %1581 = vmatpush1.bf16.msra.mxu0 %v2028_v1  ;;  %1613 = vmatpush1.bf16.msra.mxu1 %v2035_v3 }
 0x271   :  { %1583 = vmatprep.subr.bf16.mxu0 %v2037_v4  ;;  %1615 = vmatprep.subr.bf16.mxu1 %v2040_v8 }
 0x274   :  { %1585 = vmatpush1.bf16.msra.mxu0 %v2049_v15  ;;  %1617 = vmatpush1.bf16.msra.mxu1 %v2054_v16 }
 0x275   :  { %1587 = vmatprep.subr.bf16.mxu0 %v2056_v19  ;;  %1619 = vmatprep.subr.bf16.mxu1 %v2059_v24 }
 0x278   :  { %1589 = vmatpush1.bf16.msra.mxu0 %v2068_v34  ;;  %1621 = vmatpush1.bf16.msra.mxu1 %v2073_v36 }
 0x279   :  { %1591 = vmatprep.subr.bf16.mxu0 %v2075_v37  ;;  %1623 = vmatprep.subr.bf16.mxu1 %v2078_v43 }
 0x27c   :  { %1593 = vmatpush1.bf16.msra.mxu0 %v2084_v50  ;;  %1625 = vmatpush1.bf16.msra.mxu1 %v2089_v52  ;;  %v1046_v52 = vld [vmem:[#allocation8] sm:$0xff] }
 0x27d   :  { %1595 = vmatprep.subr.bf16.mxu0 %v2091_v55  ;;  %1627 = vmatprep.subr.bf16.mxu1 %v2094_v59  ;;  %v1047_v55 = vld [vmem:[#allocation8 + $0x8] sm:$0xff]  ;;  %v1064_v59 = vld [vmem:[#allocation8 + $0x90] sm:$0xff] }
 0x27e   :  { %v1632_v9 = vpack.c.bf16 %v1047_v55, %v1046_v52  ;;  %v1081_v52 = vld [vmem:[#allocation8 + $0x118] sm:$0xff] }
 0x280   :  { %1597 = vmatpush1.bf16.msra.mxu0 %v2097_v62  ;;  %1629 = vmatpush1.bf16.msra.mxu1 %v2101_v63  ;;  %v1065_v62 = vld [vmem:[#allocation8 + $0x98] sm:$0xff] }
 0x281   :  { %1631 = vmatprep.subr.bf16.mxu0 %v1630_v26  ;;  %v1634_v14 = vpack.c.bf16 %v1065_v62, %v1064_v59  ;;  %v1074_v26 = vld [vmem:[#allocation8 + $0xe0] sm:$0xff]  ;;  %v1099_v62 = vld [vmem:[#allocation8 + $0x1a8] sm:$0xff] }
 0x282   :  { %v1098_v59 = vld [vmem:[#allocation8 + $0x1a0] sm:$0xff] }
 0x336   :  { %v766_v30 = vpop.f32.mrb[4].mxu0  ;;  %v837_v31 = vpop.f32.mrb[4].mxu1 }
 0x337   :  { %v1698_v35 = vadd.f32 %v766_v30, %v2147_v10  ;;  %v768_v39 = vpop.f32.mrb[5].mxu0  ;;  %v839_v40 = vpop.f32.mrb[5].mxu1  ;;  %v1706_v1 = vadd.f32 %v837_v31, %v2156_v38  ;;  %v1075_v30 = vld [vmem:[#allocation8 + $0xe8] sm:$0xff]  ;;  %v1652_v31 = vpack.c.bf16 %v1057_v22, %v1056_v0 }
 0x338   :  { %v1699_v44 = vadd.f32 %v768_v39, %v2149_v11  ;;  %v1707_v54 = vadd.f32 %v839_v40, %v2153_v29  ;;  %v1058_v39 = vld [vmem:[#allocation8 + $0x60] sm:$0xff]  ;;  %v1059_v40 = vld [vmem:[#allocation8 + $0x68] sm:$0xff] }
 0x339   :  { %v1289_v51 = vmul.f32 -1.442695, %v1698_v35  ;;  %v1654_v35 = vpack.c.bf16 %v1075_v30, %v1074_v26  ;;  %v1092_v26 = vld [vmem:[#allocation8 + $0x170] sm:$0xff]  ;;  %v1093_v30 = vld [vmem:[#allocation8 + $0x178] sm:$0xff] }
 0x33a   :  { %v1290_v53 = vmul.f32 -1.442695, %v1699_v44  ;;  %v1291_v58 = vmul.f32 -1.442695, %v1707_v54  ;;  %v1076_v44 = vld [vmem:[#allocation8 + $0xf0] sm:$0xff] }
 0x33b   :  { %1767 = vpow2.f32 %v1289_v51  ;;  %v1077_v51 = vld [vmem:[#allocation8 + $0xf8] sm:$0xff] }
 0x33c   :  { %1769 = vpow2.f32 %v1290_v53  ;;  %v1656_v53 = vpack.c.bf16 %v1059_v40, %v1058_v39  ;;  %v1658_v54 = vpack.c.bf16 %v1077_v51, %v1076_v44 }
 0x33d   :  { %1771 = vpow2.f32 %v1291_v58  ;;  %v1060_v58 = vld [vmem:[#allocation8 + $0x70] sm:$0xff] }
 0x33e   :  { %1773 = vtanh.f32 %v1706_v1  ;;  %v1061_v1 = vld [vmem:[#allocation8 + $0x78] sm:$0xff] }
 0x345   :  { %v1768_v3 = vpop.eup %1767 }
 0x346   :  { %v1770_v4 = vpop.eup %1769  ;;  %v849_v8 = vadd.f32 1.0, %v1768_v3  ;;  %v1660_v3 = vpack.c.bf16 %v1061_v1, %v1060_v58 }
 0x347   :  { %v855_v15 = vadd.f32 1.0, %v1770_v4  ;;  %v1772_v16 = vpop.eup %1771  ;;  %v1094_v4 = vld [vmem:[#allocation8 + $0x180] sm:$0xff] }
 0x348   :  { %1775 = vrcp.f32 %v849_v8  ;;  %v1774_v19 = vpop.eup %1773  ;;  %v862_v37 = vadd.f32 1.0, %v1772_v16  ;;  %v1095_v8 = vld [vmem:[#allocation8 + $0x188] sm:$0xff]  ;;  %v1078_v16 = vld [vmem:[#allocation8 + $0x100] sm:$0xff] }
 0x349   :  { %1777 = vrcp.f32 %v855_v15  ;;  %v1662_v15 = vpack.c.bf16 %v1095_v8, %v1094_v4 }
 0x34a   :  { %1779 = vrcp.f32 %v862_v37 }
 0x34b   :  { %1663 = vmatprep.subr.bf16.mxu1 %v1662_v15 }
 0x352   :  { %v1776_v24 = vpop.eup %1775 }
 0x353   :  { %v1778_v34 = vpop.eup %1777  ;;  %v866_v36 = vmul.f32 %v1776_v24, %v1774_v19  ;;  %v1079_v19 = vld [vmem:[#allocation8 + $0x108] sm:$0xff] }
 0x354   :  { %v865_v43 = vmul.f32 %v1778_v34, %v2205_v61  ;;  %v1780_v63 = vpop.eup %1779  ;;  %v1072_v61 = vld [vmem:[#allocation8 + $0xd0] sm:$0xff]  ;;  %v1664_v24 = vpack.c.bf16 %v1079_v19, %v1078_v16 }
 0x355   :  { %v1096_v34 = vld [vmem:[#allocation8 + $0x190] sm:$0xff] }
 0x356   :  { %v2249_v50 = vadd.f32 %v866_v36, %v865_v43  ;;  %v1097_v36 = vld [vmem:[#allocation8 + $0x198] sm:$0xff]  ;;  %v1080_v43 = vld [vmem:[#allocation8 + $0x110] sm:$0xff] }
 0x357   :  { %v1666_v37 = vpack.c.bf16 %v1097_v36, %v1096_v34  ;;  %v1668_v55 = vpack.c.bf16 %v1081_v52, %v1080_v43 }
 0x358   :  { %1781 = vtanh.f32 %v2249_v50 }
 0x362   :  { %v1782_v6 = vpop.eup %1781 }
 0x363   :  { %v2252_v13 = vmul.f32 %v1782_v6, %v1780_v63  ;;  %v1670_v63 = vpack.c.bf16 %v1099_v62, %v1098_v59  ;;  %v1083_v6 = vld [vmem:[#allocation8 + $0x128] sm:$0xff] }
 0x365   :  { %936 = vmatmul.mubr.f32.vlgmr.msra.gmra.mrb[6].mxu0 %v2252_v13  ;;  %1007 = vmatmul.mubr.f32.vlgmr.msra.gmra.mrb[6].mxu1 %v2252_v13 }
 0x366   :  { %1633 = vmatpush3.bf16.msra.mxu0 %v1632_v9  ;;  %1181 = vmatprep.mubr.f32.mxu0 %v2208_v7  ;;  %v1650_v7 = vpack.c.bf16 %v1073_v2, %v1072_v61  ;;  %v1091_v2 = vld [vmem:[#allocation8 + $0x168] sm:$0xff] }
 0x367   :  { %1635 = vmatprep.subr.bf16.mxu0 %v1634_v14  ;;  %1665 = vmatpush3.bf16.msra.mxu1 %v1664_v24  ;;  %v1100_v14 = vld [vmem:[#allocation8 + $0x1b0] sm:$0xff]  ;;  %v1688_v0 = vpack.c.bf16 %v1091_v2, %v1090_v60 }
 0x368   :  { %1667 = vmatprep.subr.bf16.mxu1 %v1666_v37  ;;  %v1674_v21 = vpack.c.bf16 %v1101_v20, %v1100_v14 }
 0x36a   :  { %1637 = vmatpush3.bf16.msra.mxu0 %v1636_v27  ;;  %v1676_v27 = vpack.c.bf16 %v1085_v25, %v1084_v23 }
 0x36b   :  { %1639 = vmatprep.subr.bf16.mxu0 %v1638_v28  ;;  %1669 = vmatpush3.bf16.msra.mxu1 %v1668_v55  ;;  %v1102_v28 = vld [vmem:[#allocation8 + $0x1c0] sm:$0xff] }
 0x36c   :  { %1671 = vmatprep.subr.bf16.mxu1 %v1670_v63  ;;  %v1678_v33 = vpack.c.bf16 %v1103_v32, %v1102_v28 }
 0x36e   :  { %1641 = vmatpush3.bf16.msra.mxu0 %v1640_v42  ;;  %v1680_v42 = vpack.c.bf16 %v1087_v17, %v1086_v41 }
 0x36f   :  { %1643 = vmatprep.subr.bf16.mxu0 %v1642_v18  ;;  %v1104_v18 = vld [vmem:[#allocation8 + $0x1d0] sm:$0xff] }
 0x370   :  { %v1682_v46 = vpack.c.bf16 %v1105_v45, %v1104_v18 }
 0x372   :  { %1645 = vmatpush3.bf16.msra.mxu0 %v1644_v49  ;;  %v1684_v49 = vpack.c.bf16 %v1089_v48, %v1088_v47 }
 0x373   :  { %1647 = vmatprep.subr.bf16.mxu0 %v1646_v56  ;;  %v1106_v56 = vld [vmem:[#allocation8 + $0x1e0] sm:$0xff] }
 0x374   :  { %v1686_v61 = vpack.c.bf16 %v1107_v57, %v1106_v56 }
 0x376   :  { %1649 = vmatpush3.bf16.msra.mxu0 %v1648_v5  ;;  %v1108_v5 = vld [vmem:[#allocation8 + $0x1f0] sm:$0xff] }
 0x377   :  { %1651 = vmatprep.subr.bf16.mxu0 %v1650_v7  ;;  %v1109_v7 = vld [vmem:[#allocation8 + $0x1f8] sm:$0xff] }
 0x378   :  { %v1690_v22 = vpack.c.bf16 %v1109_v7, %v1108_v5 }
 0x37a   :  { %1653 = vmatpush3.bf16.msra.mxu0 %v1652_v31  ;;  %v1692_v31 = vpack.c.bf16 %v1093_v30, %v1092_v26 }
 0x37b   :  { %1655 = vmatprep.subr.bf16.mxu0 %v1654_v35 }
 0x37e   :  { %1657 = vmatpush3.bf16.msra.mxu0 %v1656_v53 }
 0x37f   :  { %1659 = vmatprep.subr.bf16.mxu0 %v1658_v54 }
 0x382   :  { %1661 = vmatpush3.bf16.msra.mxu0 %v1660_v3 }
 0x385   :  { %1182 = vmatmul.mubr.f32.vlgmr.msra.gmra.mrb[8].mxu0 %v2162_v12  ;;  %v1082_v12 = vld [vmem:[#allocation8 + $0x120] sm:$0xff] }
 0x386   :  { %v1672_v9 = vpack.c.bf16 %v1083_v6, %v1082_v12  ;;  %v1295_v12 = vld [vmem:[%s2284_s5] ss:$0 sm:$0xff] }
 0x388   :  { %1673 = vmatpush3.bf16.msra.mxu1 %v1672_v9 }
 0x389   :  { %1675 = vmatprep.subr.bf16.mxu1 %v1674_v21 }
 0x38c   :  { %1677 = vmatpush3.bf16.msra.mxu1 %v1676_v27 }
 0x38d   :  { %1679 = vmatprep.subr.bf16.mxu1 %v1678_v33 }
 0x390   :  { %1681 = vmatpush3.bf16.msra.mxu1 %v1680_v42 }
 0x391   :  { %1683 = vmatprep.subr.bf16.mxu1 %v1682_v46 }
 0x394   :  { %1685 = vmatpush3.bf16.msra.mxu1 %v1684_v49 }
 0x395   :  { %1687 = vmatprep.subr.bf16.mxu1 %v1686_v61 }
 0x398   :  { %1689 = vmatpush3.bf16.msra.mxu1 %v1688_v0 }
 0x399   :  { %1691 = vmatprep.subr.bf16.mxu1 %v1690_v22 }
 0x39c   :  { %1693 = vmatpush3.bf16.msra.mxu1 %v1692_v31 }
 0x438   :  { %v937_v35 = vpop.f32.mrb[6].mxu0  ;;  %v1008_v39 = vpop.f32.mrb[6].mxu1 }
 0x439   :  { %v1700_v40 = vadd.f32 %v937_v35, %v2147_v10  ;;  %v939_v44 = vpop.f32.mrb[7].mxu0  ;;  %v1010_v51 = vpop.f32.mrb[7].mxu1  ;;  %v1708_v4 = vadd.f32 %v1008_v39, %v2156_v38 }
 0x43a   :  { %v1701_v53 = vadd.f32 %v939_v44, %v2149_v11  ;;  %v1709_v1 = vadd.f32 %v1010_v51, %v2153_v29 }
 0x43b   :  { %v1292_v54 = vmul.f32 -1.442695, %v1700_v40 }
 0x43c   :  { %v1293_v58 = vmul.f32 -1.442695, %v1701_v53  ;;  %v1294_v3 = vmul.f32 -1.442695, %v1709_v1 }
 0x43d   :  { %1783 = vpow2.f32 %v1292_v54 }
 0x43e   :  { %1785 = vpow2.f32 %v1293_v58 }
 0x43f   :  { %1787 = vpow2.f32 %v1294_v3 }
 0x440   :  { %1789 = vtanh.f32 %v1708_v4 }
 0x447   :  { %v1784_v8 = vpop.eup %1783 }
 0x448   :  { %v1786_v15 = vpop.eup %1785  ;;  %v1020_v16 = vadd.f32 1.0, %v1784_v8 }
 0x449   :  { %v1026_v19 = vadd.f32 1.0, %v1786_v15  ;;  %v1788_v10 = vpop.eup %1787 }
 0x44a   :  { %1791 = vrcp.f32 %v1020_v16  ;;  %v1790_v24 = vpop.eup %1789  ;;  %v1033_v37 = vadd.f32 1.0, %v1788_v10 }
 0x44b   :  { %1793 = vrcp.f32 %v1026_v19 }
 0x44c   :  { %1795 = vrcp.f32 %v1033_v37 }
 0x454   :  { %v1792_v11 = vpop.eup %1791 }
 0x455   :  { %v1794_v34 = vpop.eup %1793  ;;  %v1037_v36 = vmul.f32 %v1792_v11, %v1790_v24 }
 0x456   :  { %v1036_v43 = vmul.f32 %v1794_v34, %v2249_v50  ;;  %v1796_v59 = vpop.eup %1795 }
 0x458   :  { %v1328_v29 = vpop.f32.mrb[8].mxu0  ;;  %v1038_v52 = vadd.f32 %v1037_v36, %v1036_v43 }
 0x459   :  { %v1329_v38 = vpop.f32.mrb[9].mxu0 }
 0x45a   :  { %v1330_v55 = vadd.f32 %v1329_v38, %v1328_v29  ;;  %1797 = vtanh.f32 %v1038_v52 }
 0x45c   :  { %v1184_v14 = vadd.f32 %v1330_v55, %v1295_v12 }
 0x464   :  { %v1798_v62 = vpop.eup %1797 }
 0x465   :  { %v1040_v63 = vmul.f32 %v1798_v62, %v1796_v59 }
 0x467   :  { %1251 = vmatprep.mubr.f32.mxu1 %v1040_v63 }
 0x468   :  { %1252 = vmatmul.mubr.f32.vlgmr.msra.gmra.mrb[8].mxu1 %v2252_v13 }
 0x53b   :  { %v1363_v6 = vpop.f32.mrb[8].mxu1 }
 0x53c   :  { %v1364_v9 = vpop.f32.mrb[9].mxu1 }
 0x53d   :  { %v1365_v50 = vadd.f32 %v1364_v9, %v1363_v6 }
 0x53f   :  { %v1254_v20 = vadd.f32 %v1365_v50, %v1184_v14 }
 0x541   :  { %v1257_v21 = vmax.f32 %v1254_v20, 0.0 }
 0x543   :  { %1258 = vst [vmem:[#allocation9] sm:$0xff] %v1257_v21 }
 0x544   :  { %1876 = shalt.err (!%p1873_p0)
}
 0x545   :  { %s1877_s5 = scalar_lea.hbm %s2285_s6, 128 }
 0x546   :  { %p1878_p1 = scmp.ne.s32.totalorder %s2285_s6, %s1877_s5  ;;  %p1881_p2 = scmp.lt.u32.totalorder %s1877_s5, %s2285_s6 }
 0x548   :  { %p1883_p3 = pnand %p1881_p2, %p1878_p1 }
 0x54a   :  { %1886 = shalt.err (!%p1883_p3)
}
 0x54b   :  { %1268 = dma.vmem_to_hbm [thread:$0]  %s1266_s2, 128, %s2285_s6, [#allocation5]  }
 0x54c   :  { %1891 = dma.done.wait [#allocation5], 128  }
 0x54d   :  { %1892 = vsyncadd [#allocation5], 4294967168 }
 0x54e   :  { %1272 = vsyncpa [#allocation4], 1 }
 0x54f   :  { %1273 = vsyncpa [#allocation7], 1 }
 0x550   :  { %1274 = vsyncpa [#allocation5], 1 }

</bundles_post_ra>
